<compile_context>
chip_gen: v5e
topology: v5e:2x2
jax: 0.10.0
libtpu: 0.0.40
codegen_flags: <defaults>
</compile_context>

<pallas_src>
import numpy as np
import jax
import jax.numpy as jnp
from jax.experimental import pallas as pl
from jax.experimental.pallas import tpu as pltpu

_SQRT2 = np.float32(np.sqrt(2.0))
_FAST_PATH_ELEMS = 64 * 1024          # below this, plain jnp beats a launch
_TILE_BUDGET_ELEMS = (2 * 1024 * 1024) // 4   # ~2 MiB of f32 output per tile


def _round_up(v, m):
    return ((v + m - 1) // m) * m


def _choose_channel_tiling(c):
    """Returns (c_pad, tile_c): lane-dense padded width and channel tile."""
    c_pad = max(128, _round_up(c, 128))
    if c_pad <= 2048:
        return c_pad, c_pad            # single channel block
    tile_c = 1024
    return _round_up(c_pad, tile_c), tile_c


def _pack_freqs_phases(freqs, phases, c_pad):
    c = freqs.shape[0]
    f = jnp.pad(freqs.astype(jnp.float32), (0, c_pad - c))
    p = jnp.pad(phases.astype(jnp.float32), (0, c_pad - c))
    return jnp.stack([f, p], axis=0)   # (2, c_pad) f32


def _mp_fourier_kernel(x_ref, fp_ref, o_ref):
    # x_ref:  (TILE_N, 1)       input dtype (cast to f32 for the math)
    # fp_ref: (2, TILE_C)       f32, row 0 = freqs, row 1 = phases
    # o_ref:  (TILE_N, TILE_C)  output dtype (== input dtype)
    x = x_ref[...].astype(jnp.float32)          # (TILE_N, 1)
    f = fp_ref[0:1, :]                          # (1, TILE_C)
    p = fp_ref[1:2, :]                          # (1, TILE_C)
    y = x * f + p                               # outer product + phase
    o_ref[...] = (jnp.cos(y) * _SQRT2).astype(o_ref.dtype)


def mp_fourier_packed(x, fp, num_channels, *, tile_n=None, tile_c=None,
                      use_pallas=None):
    """x: (N,) float; fp: (2, C_pad) f32 packed freqs/phases. -> (N, C) x.dtype."""
    assert x.ndim == 1, "MPFourier expects a 1-D input (torch.ger semantics)"
    n = x.shape[0]
    c = num_channels
    c_pad = fp.shape[1]
    out_dtype = x.dtype

    # Small-problem fast path: pallas_call launch overhead dominates; a plain
    # jnp expression is cheaper and fuses into the consumer for free.
    if use_pallas is None:
        use_pallas = (n * c_pad) >= _FAST_PATH_ELEMS
    if not use_pallas:
        y = x.astype(jnp.float32)[:, None] * fp[0, :c][None, :] + fp[1, :c][None, :]
        return (jnp.cos(y) * _SQRT2).astype(out_dtype)

    # Channel tiling (lane-dense, multiple of 128).
    if tile_c is None:
        tile_c = c_pad if c_pad <= 2048 else 1024
    assert c_pad % tile_c == 0 and tile_c % 128 == 0
    grid_c = c_pad // tile_c

    # Row tiling: ~2 MiB f32 output per tile, multiple of 16 (covers bf16
    # packed layout), and at least 2 grid steps when possible so the
    # "parallel" axes can shard across v7x's two TensorCores.
    if tile_n is None:
        tile_n = max(16, (_TILE_BUDGET_ELEMS // tile_c) // 16 * 16)
    if grid_c == 1 and n >= 32:
        tile_n = min(tile_n, _round_up(pl.cdiv(n, 2), 16))
    tile_n = max(16, (tile_n // 16) * 16)
    tile_n = min(tile_n, _round_up(n, 16))
    grid_n = pl.cdiv(n, tile_n)

    x2 = x.reshape(n, 1)

    out = pl.pallas_call(
        _mp_fourier_kernel,
        out_shape=jax.ShapeDtypeStruct((n, c_pad), out_dtype),
        grid_spec=pltpu.PrefetchScalarGridSpec(
            num_scalar_prefetch=0,
            grid=(grid_n, grid_c),
            in_specs=[
                pl.BlockSpec((tile_n, 1), lambda i, j: (i, 0)),
                pl.BlockSpec((2, tile_c), lambda i, j: (0, j)),
            ],
            out_specs=pl.BlockSpec((tile_n, tile_c), lambda i, j: (i, j)),
        ),
        compiler_params=pltpu.CompilerParams(
            dimension_semantics=("parallel", "parallel")),
    )(x2, fp)

    # Column slice only when C is not lane-aligned; rows were never padded.
    if c_pad != c:
        out = out[:, :c]
    return out


def mp_fourier(x, freqs, phases, **kwargs):
    """Standalone convenience wrapper (packs freqs/phases per call).
    Prefer MPFourierJax, which packs the constant once at init."""
    c = freqs.shape[0]
    c_pad, tile_c = _choose_channel_tiling(c)
    fp = _pack_freqs_phases(freqs, phases, c_pad)
    return mp_fourier_packed(x, fp, c, tile_c=tile_c, **kwargs)


class MPFourierJax:
    """Parameter container mirroring the PyTorch module's __init__."""

    def __init__(self, num_channels, bandwidth=1, key=None):
        if key is None:
            key = jax.random.PRNGKey(0)
        k1, k2 = jax.random.split(key)
        self.num_channels = num_channels
        # freqs  = 2*pi * randn(num_channels) * bandwidth
        # phases = 2*pi * rand(num_channels)
        self.freqs = (2.0 * np.pi) * jax.random.normal(
            k1, (num_channels,), dtype=jnp.float32) * bandwidth
        self.phases = (2.0 * np.pi) * jax.random.uniform(
            k2, (num_channels,), dtype=jnp.float32)
        # Precompute the padded/stacked constant once (perf feedback #1).
        self.c_pad, self.tile_c = _choose_channel_tiling(num_channels)
        self.fp = _pack_freqs_phases(self.freqs, self.phases, self.c_pad)

    def __call__(self, x, *, use_pallas=None):
        return mp_fourier_packed(x, self.fp, self.num_channels,
                                 tile_c=self.tile_c, use_pallas=use_pallas)


def _reference(x, freqs, phases):
    y = jnp.outer(x.astype(jnp.float32), freqs.astype(jnp.float32))
    y = y + phases.astype(jnp.float32)
    return (jnp.cos(y) * np.float32(np.sqrt(2.0))).astype(x.dtype)


if __name__ == "__main__":
    key = jax.random.PRNGKey(0)
    k_param, k_x1, k_x2 = jax.random.split(key, 3)

    # Case 1: small, realistic EDM2-style shapes (batch=8, channels=32).
    # Auto path -> jnp fast path (launch-overhead-bound regime).
    num_channels = 32
    batch = 8
    module = MPFourierJax(num_channels, bandwidth=1, key=k_param)
    x = jax.random.normal(k_x1, (batch,), dtype=jnp.float32)
    out = jax.block_until_ready(module(x))
    ref = _reference(x, module.freqs, module.phases)
    assert out.shape == (batch, num_channels)
    assert out.dtype == x.dtype
    np.testing.assert_allclose(np.asarray(out), np.asarray(ref),
                               rtol=1e-5, atol=1e-5)

    # Case 1b: same small shapes, but force the Pallas kernel path.
    out_k = jax.block_until_ready(module(x, use_pallas=True))
    np.testing.assert_allclose(np.asarray(out_k), np.asarray(ref),
                               rtol=1e-5, atol=1e-5)

    # Case 2: non-aligned N and C > 128 -> multi-row-tile grid (grid_n >= 2),
    # boundary row block, and column slice for the unaligned channel count.
    num_channels2 = 192
    batch2 = 300
    module2 = MPFourierJax(num_channels2, bandwidth=1, key=k_param)
    x2 = jax.random.normal(k_x2, (batch2,), dtype=jnp.float32)
    out2 = jax.block_until_ready(module2(x2, use_pallas=True))
    ref2 = _reference(x2, module2.freqs, module2.phases)
    assert out2.shape == (batch2, num_channels2)
    np.testing.assert_allclose(np.asarray(out2), np.asarray(ref2),
                               rtol=1e-5, atol=1e-5)

    print("KERNEL_OK")
</pallas_src>

<mosaic_0001>
module attributes {stable_mosaic.version = 11 : i64} {
  func.func @_mp_fourier_kernel(%arg0: i32, %arg1: i32, %arg2: memref<16x1xf32, #tpu.memory_space<vmem>>, %arg3: memref<2x128xf32, #tpu.memory_space<vmem>>, %arg4: memref<16x128xf32, #tpu.memory_space<vmem>>) attributes {dimension_semantics = [#tpu.dimension_semantics<parallel>, #tpu.dimension_semantics<parallel>], iteration_bounds = array<i64: 1, 1>, scalar_prefetch = 0 : i64, scratch_operands = 0 : i64, tpu.core_type = #tpu.core_type<tc>, window_params = [{transform_indices = @transform_0, window_bounds = array<i64: 16, 1>}, {transform_indices = @transform_1, window_bounds = array<i64: 2, 128>}, {transform_indices = @transform_2, window_bounds = array<i64: 16, 128>}]} {
    %c0 = arith.constant 0 : index
    %c0_0 = arith.constant 0 : index
    %0 = vector.load %arg2[%c0, %c0_0] : memref<16x1xf32, #tpu.memory_space<vmem>>, vector<16x1xf32>
    %c0_1 = arith.constant 0 : index
    %c0_2 = arith.constant 0 : index
    %1 = vector.load %arg3[%c0_1, %c0_2] : memref<2x128xf32, #tpu.memory_space<vmem>>, vector<1x128xf32>
    %c1 = arith.constant 1 : index
    %c0_3 = arith.constant 0 : index
    %2 = vector.load %arg3[%c1, %c0_3] : memref<2x128xf32, #tpu.memory_space<vmem>>, vector<1x128xf32>
    %3 = vector.broadcast %0 : vector<16x1xf32> to vector<16x128xf32>
    %4 = vector.broadcast %1 : vector<1x128xf32> to vector<16x128xf32>
    %5 = arith.mulf %3, %4 : vector<16x128xf32>
    %6 = vector.broadcast %2 : vector<1x128xf32> to vector<16x128xf32>
    %7 = arith.addf %5, %6 : vector<16x128xf32>
    %8 = math.cos %7 : vector<16x128xf32>
    %cst = arith.constant 1.41421354 : f32
    %9 = vector.broadcast %cst : f32 to vector<16x128xf32>
    %10 = arith.mulf %8, %9 : vector<16x128xf32>
    %c0_4 = arith.constant 0 : index
    %c0_5 = arith.constant 0 : index
    %11 = vector.load %arg4[%c0_4, %c0_5] : memref<16x128xf32, #tpu.memory_space<vmem>>, vector<16x128xf32>
    tpu.vector_store %arg4[%c0_4, %c0_5], %10 {strides = array<i32>} : memref<16x128xf32, #tpu.memory_space<vmem>>, vector<16x128xf32>,
    return
  }
  func.func @transform_0(%arg0: i32, %arg1: i32) -> (i32, i32) {
    %c0_i32 = arith.constant 0 : i32
    %c0_i32_0 = arith.constant 0 : i32
    return %arg0, %c0_i32 : i32, i32
  }
  func.func @transform_1(%arg0: i32, %arg1: i32) -> (i32, i32) {
    %c0_i32 = arith.constant 0 : i32
    %c0_i32_0 = arith.constant 0 : i32
    return %c0_i32, %arg1 : i32, i32
  }
  func.func @transform_2(%arg0: i32, %arg1: i32) -> (i32, i32) {
    %c0_i32 = arith.constant 0 : i32
    return %arg0, %arg1 : i32, i32
  }
}

</mosaic_0001>

<bundles_post_ra>
// kernel: tpu_custom_call.1
= control target key start
LH: loop header
LB: loop body
LE: loop exit
PB: predicated region body
PF: predicated region fallthrough
CT: control target
= control target key end

     0   :  { %s601_s0 = inlined_call_operand.vmem [shape: f32[8,1], index: 0, kind: input, shape index: {}]   ;;  %s602_s1 = inlined_call_operand.vmem [shape: f32[2,128], index: 1, kind: input, shape index: {}]   ;;  %s603_s2 = inlined_call_operand.hbm [shape: f32[8,128], index: 2, kind: output, shape index: {}]  }
   0x1   :  { %v12_v0 = vld [vmem:[%s601_s0] sm:$0xff] }
   0x2   :  { %7 = vsyncpa [#allocation3], 0  ;;  %v407_v1 = vmov 0   ;;  %v13_v2 = vld [vmem:[%s601_s0 + $0x8] sm:$0xff]  ;;  %v379_v3 = vld [vmem:[%s602_s1] ss:$0 sm:$0xff] }
   0x3   :  { %378 = vset.pattern.permute.xlu0 %v407_v1  ;;  %v380_v4 = vld [vmem:[%s602_s1 + $0x1] ss:$0 sm:$0xff]  ;;  %v408_v28 = vmov 683565275   ;;  %v409_v30 = vmov 2475754826  }
   0x4   :  { %18 = vperm.xlu0 %378, %v12_v0   ;;  %v410_v34 = vmov 2131351028   ;;  %v411_v37 = vmov 2102212464   ;;  %v412_v40 = vmov 920167782  }
   0x5   :  { %v413_v43 = vmov 1326507024  }
   0xc   :  { %23 = vperm.xlu0 %378, %v13_v2  }
  0x76   :  { %v19_v5 = vpop.permute.xlu0 %18 }
  0x77   :  { %v27_v6 = vmul.f32 %v379_v3, %v19_v5 }
  0x79   :  { %v445_v7 = vadd.f32 %v380_v4, %v27_v6 }
  0x7b   :  { %v32_v8 = vand.u32 2147483647, %v445_v7  ;;  %v35_v9 = vand.u32 2139095040, %v445_v7 }
  0x7d   :  { %v36_v10 = vshrl.u32 %v35_v9, 23  ;;  %v39_v11 = vand.u32 8388607, %v32_v8 }
  0x7e   :  { %v24_v12 = vpop.permute.xlu0 %23 }
  0x7f   :  { %v28_v13 = vmul.f32 %v379_v3, %v24_v12  ;;  %v362_v14 = vadd.s32 4294967169, %v36_v10  ;;  %v40_v15 = vor.u32 8388608, %v39_v11 }
  0x81   :  { %v451_v16 = vadd.f32 %v380_v4, %v28_v13  ;;  %v42_v17 = vadd.s32 1, %v362_v14  ;;  %v453_v18 = vshll.u32 %v40_v15, 8 }
  0x83   :  { %vm43_vm0 = vcmp.gt.s32.totalorder %v42_v17, 0  ;;  %v186_v20 = vand.u32 2147483647, %v451_v16  ;;  %v189_v21 = vand.u32 2139095040, %v451_v16  ;;  %v81_v24 = vand.u32 65535, %v453_v18 }
  0x84   :  { %v44_v19 = vsel %vm43_vm0, %v42_v17, 0  ;;  %v82_v25 = vshrl.u32 %v453_v18, 16 }
  0x85   :  { %v46_v22 = vand.u32 31, %v44_v19  ;;  %v190_v26 = vshrl.u32 %v189_v21, 23  ;;  %v45_v27 = vshrl.u32 %v44_v19, 5  ;;  %v463_v32 = vand.u32 8388607, %v186_v20 }
  0x87   :  { %v47_v23 = vsub.s32 32, %v46_v22  ;;  %v49_v29 = vshll.u32 %v408_v28, %v46_v22  ;;  %v52_v31 = vshll.u32 %v409_v30, %v46_v22  ;;  %v55_v36 = vshll.u32 %v410_v34, %v46_v22 }
  0x88   :  { %v58_v39 = vshll.u32 %v411_v37, %v46_v22  ;;  %v61_v42 = vshll.u32 %v412_v40, %v46_v22  ;;  %v365_v48 = vadd.s32 4294967169, %v190_v26  ;;  %vm64_vm1 = vcmp.lt.s32.totalorder %v45_v27, 1 }
  0x89   :  { %v50_v33 = vshrl.u32 %v409_v30, %v47_v23  ;;  %v53_v35 = vshrl.u32 %v410_v34, %v47_v23  ;;  %v56_v38 = vshrl.u32 %v411_v37, %v47_v23  ;;  %v59_v41 = vshrl.u32 %v412_v40, %v47_v23 }
  0x8a   :  { %v62_v44 = vshrl.u32 %v413_v43, %v47_v23  ;;  %vm67_vm2 = vcmp.lt.s32.totalorder %v45_v27, 4  ;;  %v48_v51 = vshrl.u32 %v408_v28, %v47_v23  ;;  %vm66_vm3 = vcmp.lt.s32.totalorder %v45_v27, 3 }
  0x8b   :  { %v51_v45 = vor.u32 %v50_v33, %v49_v29  ;;  %v54_v46 = vor.u32 %v53_v35, %v52_v31  ;;  %v57_v47 = vor.u32 %v56_v38, %v55_v36  ;;  %v60_v49 = vor.u32 %v59_v41, %v58_v39 }
  0x8c   :  { %v63_v50 = vor.u32 %v62_v44, %v61_v42  ;;  %v196_v57 = vadd.s32 1, %v365_v48  ;;  %vm65_vm4 = vcmp.lt.s32.totalorder %v45_v27, 2  ;;  %v194_v5 = vor.u32 8388608, %v463_v32 }
  0x8d   :  { %v69_v52 = vsel %vm67_vm2, %v57_v47, 2102212464  ;;  %v72_v53 = vsel %vm64_vm1, %v51_v45, %v54_v46  ;;  %v76_v54 = vsel %vm64_vm1, %v54_v46, %v57_v47  ;;  %v73_v55 = vsel %vm67_vm2, %v60_v49, 920167782 }
  0x8e   :  { %v77_v56 = vsel %vm67_vm2, %v63_v50, 1326507024  ;;  %v68_v58 = vsel %vm64_vm1, %v48_v51, %v51_v45  ;;  %v74_v59 = vsel %vm66_vm3, %v57_v47, %v73_v55  ;;  %v70_v61 = vsel %vm66_vm3, %v54_v46, %v69_v52 }
  0x8f   :  { %v78_v60 = vsel %vm66_vm3, %v60_v49, %v77_v56  ;;  %v75_v62 = vsel %vm65_vm4, %v72_v53, %v74_v59  ;;  %vm197_vm5 = vcmp.gt.s32.totalorder %v196_v57, 0  ;;  %v475_v6 = vsel %vm65_vm4, %v68_v58, %v70_v61 }
  0x90   :  { %v79_v63 = vsel %vm65_vm4, %v76_v54, %v78_v60  ;;  %v105_v3 = vand.u32 65535, %v75_v62  ;;  %v106_v4 = vshrl.u32 %v75_v62, 16  ;;  %v198_v11 = vsel %vm197_vm5, %v196_v57, 0 }
  0x91   :  { %v83_v0 = vand.u32 65535, %v79_v63  ;;  %v84_v2 = vshrl.u32 %v79_v63, 16  ;;  %v200_v33 = vand.u32 31, %v198_v11  ;;  %v482_v44 = vshrl.u32 %v198_v11, 5 }
  0x92   :  { %v108_v14 = vmul.u32 %v106_v4, %v81_v24  ;;  %v109_v15 = vmul.u32 %v105_v3, %v82_v25  ;;  %v107_v21 = vmul.u32 %v105_v3, %v81_v24  ;;  %v110_v22 = vmul.u32 %v106_v4, %v82_v25 }
  0x93   :  { %v86_v9 = vmul.u32 %v84_v2, %v81_v24  ;;  %v87_v10 = vmul.u32 %v83_v0, %v82_v25  ;;  %v85_v12 = vmul.u32 %v83_v0, %v81_v24  ;;  %v88_v13 = vmul.u32 %v84_v2, %v82_v25 }
  0x94   :  { %v111_v27 = vshll.u32 %v108_v14, 16  ;;  %v112_v29 = vshrl.u32 %v108_v14, 16  ;;  %v113_v32 = vshll.u32 %v109_v15, 16  ;;  %v114_v36 = vshrl.u32 %v109_v15, 16 }
  0x95   :  { %v89_v17 = vshll.u32 %v86_v9, 16  ;;  %v90_v19 = vshrl.u32 %v86_v9, 16  ;;  %v91_v23 = vshll.u32 %v87_v10, 16  ;;  %v92_v26 = vshrl.u32 %v87_v10, 16 }
  0x96   :  { %vm115_vm7 = vc.u32 %v107_v21, %v111_v27  ;;  %v117_v38 = vadd.s32 %v111_v27, %v107_v21  ;;  %v479_v42 = vsub.s32 32, %v200_v33  ;;  %v203_v48 = vshll.u32 %v408_v28, %v200_v33 }
  0x97   :  { %vm93_vm6 = vc.u32 %v85_v12, %v89_v17  ;;  %v95_v31 = vadd.s32 %v89_v17, %v85_v12  ;;  %v116_v41 = vsel %vm115_vm7, 1, %v407_v1  ;;  %v206_v51 = vshll.u32 %v409_v30, %v200_v33 }
  0x98   :  { %v94_v35 = vsel %vm93_vm6, 1, %v407_v1  ;;  %v118_v25 = vadd.s32 %v116_v41, %v110_v22  ;;  %vm119_vm9 = vc.u32 %v117_v38, %v113_v32  ;;  %v485_v47 = vadd.s32 %v117_v38, %v113_v32 }
  0x99   :  { %v96_v39 = vadd.s32 %v94_v35, %v88_v13  ;;  %vm97_vm8 = vc.u32 %v95_v31, %v91_v23  ;;  %v120_v46 = vsel %vm119_vm9, 1, %v407_v1  ;;  %v204_v50 = vshrl.u32 %v409_v30, %v479_v42 }
  0x9a   :  { %v98_v24 = vsel %vm97_vm8, 1, %v407_v1  ;;  %v122_v49 = vadd.s32 %v120_v46, %v118_v25  ;;  %v207_v52 = vshrl.u32 %v410_v34, %v479_v42  ;;  %v209_v54 = vshll.u32 %v410_v34, %v200_v33 }
  0x9b   :  { %v100_v45 = vadd.s32 %v98_v24, %v96_v39  ;;  %v210_v55 = vshrl.u32 %v411_v37, %v479_v42  ;;  %v212_v56 = vshll.u32 %v411_v37, %v200_v33  ;;  %v497_v58 = vor.u32 %v204_v50, %v203_v48 }
  0x9c   :  { %v123_v57 = vadd.s32 %v122_v49, %v112_v29  ;;  %v499_v59 = vor.u32 %v207_v52, %v206_v51  ;;  %v213_v60 = vshrl.u32 %v412_v40, %v479_v42  ;;  %v215_v62 = vshll.u32 %v412_v40, %v200_v33 }
  0x9d   :  { %v101_v53 = vadd.s32 %v100_v45, %v90_v19  ;;  %v211_v61 = vor.u32 %v210_v55, %v209_v54  ;;  %v216_v34 = vshrl.u32 %v413_v43, %v479_v42  ;;  %vm218_vm11 = vcmp.lt.s32.totalorder %v482_v44, 1 }
  0x9e   :  { %v124_v63 = vadd.s32 %v123_v57, %v114_v36  ;;  %v214_v0 = vor.u32 %v213_v60, %v212_v56  ;;  %v511_v2 = vshll.u32 %v194_v5, 8  ;;  %v125_v3 = vmul.u32 %v453_v18, %v475_v6 }
  0x9f   :  { %v503_v30 = vadd.s32 %v101_v53, %v92_v26  ;;  %v217_v37 = vor.u32 %v216_v34, %v215_v62  ;;  %vm221_vm12 = vcmp.lt.s32.totalorder %v482_v44, 4  ;;  %v226_v40 = vsel %vm218_vm11, %v497_v58, %v499_v59 }
  0xa0   :  { %v128_v4 = vadd.s32 1, %v124_v63  ;;  %vm220_vm13 = vcmp.lt.s32.totalorder %v482_v44, 3  ;;  %v227_v43 = vsel %vm221_vm12, %v214_v0, 920167782  ;;  %v230_v5 = vsel %vm218_vm11, %v499_v59, %v211_v61 }
  0xa1   :  { %vm127_vm10 = vc.u32 %v503_v30, %v485_v47  ;;  %v231_v18 = vsel %vm221_vm12, %v217_v37, 1326507024  ;;  %vm219_vm14 = vcmp.lt.s32.totalorder %v482_v44, 2  ;;  %v228_v9 = vsel %vm220_vm13, %v211_v61, %v227_v43 }
  0xa2   :  { %v129_v6 = vsel %vm127_vm10, %v128_v4, %v124_v63  ;;  %v232_v10 = vsel %vm220_vm13, %v214_v0, %v231_v18  ;;  %v229_v12 = vsel %vm219_vm14, %v226_v40, %v228_v9  ;;  %v235_v14 = vand.u32 65535, %v511_v2 }
  0xa3   :  { %v130_v11 = vadd.s32 %v129_v6, %v125_v3  ;;  %v233_v13 = vsel %vm219_vm14, %v230_v5, %v232_v10  ;;  %v236_v15 = vshrl.u32 %v511_v2, 16  ;;  %v260_v21 = vshrl.u32 %v229_v12, 16 }
  0xa4   :  { %v237_v17 = vand.u32 65535, %v233_v13  ;;  %v238_v19 = vshrl.u32 %v233_v13, 16  ;;  %v259_v23 = vand.u32 65535, %v229_v12  ;;  %v223_v60 = vsel %vm221_vm12, %v211_v61, 2102212464 }
  0xa5   :  { %v131_v22 = vadd.s32 536870912, %v130_v11  ;;  %v262_v31 = vmul.u32 %v260_v21, %v235_v14  ;;  %v264_v52 = vmul.u32 %v260_v21, %v236_v15  ;;  %v202_v0 = vshrl.u32 %v408_v28, %v479_v42 }
  0xa6   :  { %v240_v26 = vmul.u32 %v238_v19, %v235_v14  ;;  %v241_v27 = vmul.u32 %v237_v17, %v236_v15  ;;  %v239_v32 = vmul.u32 %v237_v17, %v235_v14  ;;  %v242_v36 = vmul.u32 %v238_v19, %v236_v15 }
  0xa7   :  { %v539_v29 = vshrl.u32 %v131_v22, 30  ;;  %v261_v38 = vmul.u32 %v259_v23, %v235_v14  ;;  %v265_v39 = vshll.u32 %v262_v31, 16  ;;  %v263_v25 = vmul.u32 %v259_v23, %v236_v15 }
  0xa8   :  { %v243_v33 = vshll.u32 %v240_v26, 16  ;;  %v245_v41 = vshll.u32 %v241_v27, 16  ;;  %v244_v48 = vshrl.u32 %v240_v26, 16  ;;  %v246_v37 = vshrl.u32 %v241_v27, 16 }
  0xa9   :  { %v133_v35 = vshll.u32 %v539_v29, 30  ;;  %vm269_vm1 = vc.u32 %v261_v38, %v265_v39  ;;  %v267_v54 = vshll.u32 %v263_v25, 16  ;;  %v271_v56 = vadd.s32 %v265_v39, %v261_v38 }
  0xaa   :  { %vm247_vm15 = vc.u32 %v239_v32, %v243_v33  ;;  %v249_v24 = vadd.s32 %v243_v33, %v239_v32  ;;  %v270_v55 = vsel %vm269_vm1, 1, %v407_v1  ;;  %v266_v40 = vshrl.u32 %v262_v31, 16 }
  0xab   :  { %v134_v45 = vsub.s32 %v130_v11, %v133_v35  ;;  %v248_v46 = vsel %vm247_vm15, 1, %v407_v1  ;;  %v272_v63 = vadd.s32 %v270_v55, %v264_v52  ;;  %vm273_vm3 = vc.u32 %v271_v56, %v267_v54 }
  0xac   :  { %v250_v49 = vadd.s32 %v248_v46, %v242_v36  ;;  %vm251_vm0 = vc.u32 %v249_v24, %v245_v41  ;;  %v274_v3 = vsel %vm273_vm3, 1, %v407_v1  ;;  %v222_v5 = vsel %vm218_vm11, %v202_v0, %v497_v58 }
  0xad   :  { %vm135_vm2 = vcmp.lt.s32.totalorder %v134_v45, 0  ;;  %v136_v50 = vsub.s32 0, %v134_v45  ;;  %v252_v51 = vsel %vm251_vm0, 1, %v407_v1  ;;  %v276_v43 = vadd.s32 %v274_v3, %v272_v63 }
  0xae   :  { %v254_v53 = vadd.s32 %v252_v51, %v250_v49  ;;  %v224_v61 = vsel %vm220_vm13, %v499_v59, %v223_v60  ;;  %v268_v6 = vshrl.u32 %v263_v25, 16  ;;  %v126_v28 = vadd.s32 %v485_v47, %v503_v30 }
  0xaf   :  { %v137_v57 = vsel %vm135_vm2, %v136_v50, %v134_v45  ;;  %v277_v9 = vadd.s32 %v276_v43, %v266_v40  ;;  %v275_v1 = vadd.s32 %v271_v56, %v267_v54  ;;  %v225_v12 = vsel %vm219_vm14, %v222_v5, %v224_v61 }
  0xb0   :  { %v138_v62 = vclz %v137_v57  ;;  %v255_v34 = vadd.s32 %v254_v53, %v244_v48  ;;  %v279_v17 = vmul.u32 %v511_v2, %v225_v12  ;;  %vm34_vm6 = vcmp.lt.s32.totalorder %v445_v7, 0 }
  0xb1   :  { %v278_v13 = vadd.s32 %v277_v9, %v268_v6  ;;  %vm567_vm7 = vcmp.le.f32.partialorder %v32_v8, 0.7853982  ;;  %v156_v48 = vsub.s32 4, %v539_v29  ;;  %vm175_vm13 = vweird.f32 %v445_v7 }
  0xb2   :  { %v363_v4 = vadd.s32 4294967294, %v138_v62  ;;  %v256_v18 = vadd.s32 %v255_v34, %v246_v37  ;;  %vm188_vm14 = vcmp.lt.s32.totalorder %v451_v16, 0  ;;  %vm586_vm15 = vcmp.le.f32.partialorder %v186_v20, 0.7853982 }
  0xb3   :  { %v282_v59 = vadd.s32 1, %v278_v13  ;;  %v157_v53 = vsel %vm34_vm6, %v156_v48, %v539_v29  ;;  %vm329_vm3 = vweird.f32 %v451_v16 }
  0xb4   :  { %vm364_vm4 = vcmp.lt.s32.totalorder %v363_v4, 0  ;;  %vm281_vm5 = vc.u32 %v256_v18, %v275_v1  ;;  %v280_v57 = vadd.s32 %v275_v1, %v256_v18  ;;  %v159_v34 = vsel %vm567_vm7, 0, %v157_v53 }
  0xb5   :  { %v141_v42 = vsel %vm364_vm4, 0, %v363_v4  ;;  %v283_v22 = vsel %vm281_vm5, %v282_v59, %v278_v13  ;;  %v176_v5 = vand.u32 3, %v159_v34 }
  0xb6   :  { %v142_v10 = vsub.s32 32, %v141_v42  ;;  %v146_v11 = vsub.s32 4294967266, %v141_v42  ;;  %v143_v58 = vshll.u32 %v134_v45, %v141_v42  ;;  %v284_v23 = vadd.s32 %v283_v22, %v279_v17 }
  0xb7   :  { %vm178_vm10 = vcmp.eq.s32.totalorder %v176_v5, 0  ;;  %vm181_vm11 = vcmp.eq.s32.totalorder %v176_v5, 2  ;;  %vm177_vm12 = vcmp.lt.s32.totalorder %v176_v5, 2 }
  0xb8   :  { %v144_v14 = vshrl.u32 %v126_v28, %v142_v10  ;;  %v147_v15 = vadd.s32 127, %v146_v11  ;;  %v285_v30 = vadd.s32 536870912, %v284_v23 }
  0xba   :  { %v145_v19 = vor.u32 %v144_v14, %v143_v58  ;;  %v148_v21 = vshll.u32 %v147_v15, 23  ;;  %v561_v31 = vshrl.u32 %v285_v30, 30 }
  0xbc   :  { %v149_v47 = vor.u32 4788187, %v148_v21  ;;  %v152_v27 = vcvt.s32.f32 %v145_v19  ;;  %v287_v32 = vshll.u32 %v561_v31, 30 }
  0xbe   :  { %v150_v26 = vand.u32 2147483647, %v149_v47  ;;  %v288_v35 = vsub.s32 %v284_v23, %v287_v32  ;;  %v310_v23 = vsub.s32 4, %v561_v31 }
  0xc0   :  { %v153_v44 = vmul.f32 %v152_v27, %v150_v26  ;;  %vm289_vm8 = vcmp.lt.s32.totalorder %v288_v35, 0  ;;  %v290_v39 = vsub.s32 0, %v288_v35  ;;  %v311_v20 = vsel %vm188_vm14, %v310_v23, %v561_v31 }
  0xc2   :  { %v154_v33 = vxor.u32 2147483648, %v153_v44  ;;  %v291_v24 = vsel %vm289_vm8, %v290_v39, %v288_v35 }
  0xc3   :  { %v292_v46 = vclz %v291_v24 }
  0xc4   :  { %v155_v36 = vsel %vm34_vm6, %v154_v33, %v153_v44  ;;  %v313_v33 = vsel %vm586_vm15, 0, %v311_v20 }
  0xc5   :  { %v158_v38 = vsel %vm567_vm7, %v445_v7, %v155_v36  ;;  %v366_v50 = vadd.s32 4294967294, %v292_v46  ;;  %v330_v39 = vand.u32 3, %v313_v33 }
  0xc6   :  { %v160_v41 = vmul.f32 %v158_v38, %v158_v38 }
  0xc7   :  { %vm367_vm9 = vcmp.lt.s32.totalorder %v366_v50, 0  ;;  %vm332_vm0 = vcmp.eq.s32.totalorder %v330_v39, 0  ;;  %vm335_vm1 = vcmp.eq.s32.totalorder %v330_v39, 2  ;;  %vm331_vm2 = vcmp.lt.s32.totalorder %v330_v39, 2 }
  0xc8   :  { %v161_v25 = vmul.f32 -0.001358992, %v160_v41  ;;  %v168_v45 = vmul.f32 -0.00019511016, %v160_v41  ;;  %v295_v54 = vsel %vm367_vm9, 0, %v366_v50 }
  0xc9   :  { %v296_v60 = vsub.s32 32, %v295_v54  ;;  %v300_v62 = vsub.s32 4294967266, %v295_v54  ;;  %v297_v3 = vshll.u32 %v288_v35, %v295_v54 }
  0xca   :  { %v162_v8 = vadd.f32 0.041655596, %v161_v25  ;;  %v169_v49 = vadd.f32 0.008332121, %v168_v45 }
  0xcb   :  { %v298_v37 = vshrl.u32 %v280_v57, %v296_v60  ;;  %v301_v4 = vadd.s32 127, %v300_v62 }
  0xcc   :  { %v163_v51 = vmul.f32 %v162_v8, %v160_v41  ;;  %v170_v52 = vmul.f32 %v169_v49, %v160_v41 }
  0xcd   :  { %v299_v61 = vor.u32 %v298_v37, %v297_v3  ;;  %v302_v6 = vshll.u32 %v301_v4, 23 }
  0xce   :  { %v164_v55 = vadd.f32 -0.4999988, %v163_v51  ;;  %v171_v56 = vadd.f32 -0.16666654, %v170_v52 }
  0xcf   :  { %v303_v28 = vor.u32 4788187, %v302_v6  ;;  %v306_v1 = vcvt.s32.f32 %v299_v61 }
  0xd0   :  { %v165_v63 = vmul.f32 %v164_v55, %v160_v41  ;;  %v172_v0 = vmul.f32 %v171_v56, %v160_v41 }
  0xd1   :  { %v304_v18 = vand.u32 2147483647, %v303_v28 }
  0xd2   :  { %v166_v40 = vadd.f32 1.0, %v165_v63  ;;  %v173_v43 = vadd.f32 1.0, %v172_v0 }
  0xd3   :  { %v307_v13 = vmul.f32 %v306_v1, %v304_v18 }
  0xd4   :  { %v174_v29 = vmul.f32 %v173_v43, %v158_v38  ;;  %v182_v9 = vxor.u32 2147483648, %v166_v40 }
  0xd5   :  { %v308_v14 = vxor.u32 2147483648, %v307_v13 }
  0xd6   :  { %v179_v42 = vxor.u32 2147483648, %v174_v29  ;;  %v183_v11 = vsel %vm181_vm11, %v182_v9, %v174_v29 }
  0xd7   :  { %v309_v17 = vsel %vm188_vm14, %v308_v14, %v307_v13 }
  0xd8   :  { %v180_v10 = vsel %vm178_vm10, %v166_v40, %v179_v42  ;;  %v312_v19 = vsel %vm586_vm15, %v451_v16, %v309_v17 }
  0xd9   :  { %v184_v12 = vsel %vm177_vm12, %v180_v10, %v183_v11  ;;  %v314_v7 = vmul.f32 %v312_v19, %v312_v19 }
  0xda   :  { %v185_v58 = vsel %vm175_vm13, nan, %v184_v12 }
  0xdb   :  { %v340_v15 = vmul.f32 1.4142135, %v185_v58  ;;  %v315_v21 = vmul.f32 -0.001358992, %v314_v7  ;;  %v322_v22 = vmul.f32 -0.00019511016, %v314_v7 }
  0xdd   :  { %342 = vst [vmem:[#allocation2] sm:$0xff] %v340_v15  ;;  %v316_v47 = vadd.f32 0.041655596, %v315_v21  ;;  %v323_v30 = vadd.f32 0.008332121, %v322_v22 }
  0xdf   :  { %v317_v26 = vmul.f32 %v316_v47, %v314_v7  ;;  %v324_v27 = vmul.f32 %v323_v30, %v314_v7 }
  0xe1   :  { %v318_v44 = vadd.f32 -0.4999988, %v317_v26  ;;  %v325_v32 = vadd.f32 -0.16666654, %v324_v27 }
  0xe3   :  { %v319_v35 = vmul.f32 %v318_v44, %v314_v7  ;;  %v326_v2 = vmul.f32 %v325_v32, %v314_v7 }
  0xe5   :  { %v320_v36 = vadd.f32 1.0, %v319_v35  ;;  %v327_v38 = vadd.f32 1.0, %v326_v2 }
  0xe7   :  { %v328_v41 = vmul.f32 %v327_v38, %v312_v19  ;;  %v336_v24 = vxor.u32 2147483648, %v320_v36 }
  0xe9   :  { %v333_v25 = vxor.u32 2147483648, %v328_v41  ;;  %v337_v46 = vsel %vm335_vm1, %v336_v24, %v328_v41 }
  0xeb   :  { %v334_v45 = vsel %vm332_vm0, %v320_v36, %v333_v25 }
  0xec   :  { %v338_v31 = vsel %vm331_vm2, %v334_v45, %v337_v46 }
  0xed   :  { %v339_v48 = vsel %vm329_vm3, nan, %v338_v31 }
  0xee   :  { %v341_v8 = vmul.f32 1.4142135, %v339_v48 }
  0xf0   :  { %343 = vst [vmem:[#allocation2 + $0x8] sm:$0xff] %v341_v8 }
  0xf1   :  { %347 = vsyncadd [#allocation3], 128  ;;  %s350_s17 = sshll.u32 %s603_s2, 4  ;;  %s414_s18 = smov [#allocation2]   ;;  %s351_s17 = int_to_ptr.hbm [resolvable:$true] %s350_s17 }
  0xf2   :  { %s348_s19 = sshll.u32 %s414_s18, 4  ;;  %s415_s20 = smov 128   ;;  %s349_s19 = int_to_ptr.vmem [resolvable:$true] %s348_s19 }
  0xf3   :  { %s416_s21 = smov 8  }
  0xf4   :  { %356 = dma.vmem_to_hbm [thread:$0]  %s349_s19, 128, %s351_s17, [#allocation3], %s415_s20, %s415_s20, %s416_s21  }
  0xf5   :  { %405 = dma.done.wait [#allocation3], 256  }
  0xf6   :  { %406 = vsyncadd [#allocation3], 4294967040 }
  0xf7   :  { %361 = vsyncpa [#allocation3], 1 }

</bundles_post_ra>
